<compile_context>
chip_gen: v7x
topology: tpu7x:2x2x1
jax: 0.10.0
libtpu: 0.0.40
codegen_flags: <defaults>
</compile_context>

<pallas_src>
from functools import partial

import jax
import jax.numpy as jnp
from jax.experimental import pallas as pl
from jax.experimental.pallas import tpu as pltpu

_LANE = 128            # last block dim: lane-dense multiple of 128
_MAX_TILE_ROWS = 1024  # 1024 x 128 x 4 B = 512 KiB per buffer (double-buffered ok on v7x)


def _round_up(n, m):
    return (n + m - 1) // m * m


def _dropout_kernel(x_ref, bits_ref, out_ref, *, threshold, scale):
    """Inverted dropout on one (TILE_ROWS, 128) tile.

    keep <=> bits >= threshold, so P(keep) = 1 - threshold / 2**32 ~= 1 - p.
    out   = keep ? x / (1 - p) : 0
    """
    x = x_ref[...].astype(jnp.float32)
    keep = bits_ref[...] >= jnp.uint32(threshold)
    out_ref[...] = jnp.where(keep, x * jnp.float32(scale), 0.0).astype(out_ref.dtype)


def no_positional_encoding(x, d_model, dropout_rate, *, key=None, training=False):
    """Pallas equivalent of NoPositionalEncoding.forward(x, offset=0).

    Returns (dropout(x), pos_emb) where pos_emb = zeros((1, T, d_model), float32).
    """
    B, T, D = x.shape
    assert D == d_model, f"x last dim {D} != d_model {d_model}"
    pos_emb = jnp.zeros((1, T, d_model), dtype=jnp.float32)

    p = float(dropout_rate)
    if (not training) or p <= 0.0:
        # Eval-mode dropout is the identity: no kernel launch, no HBM traffic.
        return x, pos_emb
    if p >= 1.0:
        return jnp.zeros_like(x), pos_emb

    if key is None:
        key = jax.random.PRNGKey(0)

    # Flatten to a lane-dense (rows, 128) slab, padded so every tile is full.
    n = B * T * D
    rows = _round_up(pl.cdiv(n, _LANE), 8)
    tile_rows = min(_MAX_TILE_ROWS, rows)
    rows = _round_up(rows, tile_rows)
    n_pad = rows * _LANE

    flat = x.reshape(-1)
    if n_pad != n:
        flat = jnp.pad(flat, (0, n_pad - n))
    x2d = flat.reshape(rows, _LANE)

    # Random bits drawn outside the kernel (portable across TPU + interpret mode).
    bits = jax.random.bits(key, (rows, _LANE), dtype=jnp.uint32)

    threshold = min(int(round(p * float(2 ** 32))), 2 ** 32 - 1)
    scale = 1.0 / (1.0 - p)
    kernel = partial(_dropout_kernel, threshold=threshold, scale=scale)

    out2d = pl.pallas_call(
        kernel,
        out_shape=jax.ShapeDtypeStruct((rows, _LANE), x.dtype),
        grid=(rows // tile_rows,),
        in_specs=[
            pl.BlockSpec((tile_rows, _LANE), lambda i: (i, 0)),  # x slab
            pl.BlockSpec((tile_rows, _LANE), lambda i: (i, 0)),  # random bits
        ],
        out_specs=pl.BlockSpec((tile_rows, _LANE), lambda i: (i, 0)),
        compiler_params=pltpu.CompilerParams(
            dimension_semantics=("parallel",)),
        # NOTE: input_output_aliases={0: 0} would drop the extra HBM buffer if the
        # (padded, flattened) x is dead after this call; omitted to keep the
        # wrapper safe to call outside jit without donation surprises.
    )(x2d, bits)

    out = out2d.reshape(-1)[:n].reshape(B, T, D)
    return out, pos_emb


if __name__ == "__main__":
    B, T, D = 2, 8, 32          # batch, seq, d_model (small shapes consistent with module)
    dropout_rate = 0.1

    root = jax.random.PRNGKey(0)
    kx, kdrop = jax.random.split(root)
    x = jax.random.normal(kx, (B, T, D), dtype=jnp.float32)

    # Eval-mode forward: dropout is identity, kernel is bypassed (perf guidance).
    out_eval, pos_emb = no_positional_encoding(x, d_model=D, dropout_rate=dropout_rate,
                                               training=False)
    out_eval = jax.block_until_ready(out_eval)
    pos_emb = jax.block_until_ready(pos_emb)
    assert out_eval.shape == (B, T, D) and out_eval.dtype == x.dtype
    assert pos_emb.shape == (1, T, D) and pos_emb.dtype == jnp.float32
    assert jnp.allclose(out_eval, x), "eval-mode dropout must be identity"
    assert jnp.all(pos_emb == 0.0), "pos_emb must be all zeros"

    # Training-mode forward: exercises the Pallas dropout kernel.
    out_tr, pos_tr = no_positional_encoding(x, d_model=D, dropout_rate=dropout_rate,
                                            key=kdrop, training=True)
    out_tr = jax.block_until_ready(out_tr)
    assert out_tr.shape == (B, T, D) and out_tr.dtype == x.dtype
    assert jnp.all(pos_tr == 0.0)

    # Every output element is either dropped (0) or scaled by 1/(1-p).
    scale = 1.0 / (1.0 - dropout_rate)
    ok = jnp.isclose(out_tr, 0.0, atol=1e-6) | jnp.isclose(out_tr, x * scale,
                                                           rtol=1e-5, atol=1e-6)
    assert bool(jnp.all(ok)), "training output must be {0, x/(1-p)} elementwise"

    # Loose sanity bound on the keep fraction (~0.9 expected).
    keep_frac = float(jnp.mean((out_tr != 0.0).astype(jnp.float32)))
    assert 0.6 <= keep_frac <= 1.0

    print("KERNEL_OK")
</pallas_src>

<mosaic_0001>
module attributes {stable_mosaic.version = 11 : i64} {
  func.func @_dropout_kernel(%arg0: i32, %arg1: memref<8x128xf32, #tpu.memory_space<vmem>>, %arg2: memref<8x128xi32, #tpu.memory_space<vmem>>, %arg3: memref<8x128xf32, #tpu.memory_space<vmem>>) attributes {dimension_semantics = [#tpu.dimension_semantics<parallel>], iteration_bounds = array<i64: 1>, scalar_prefetch = 0 : i64, scratch_operands = 0 : i64, tpu.core_type = #tpu.core_type<tc>, window_params = [{transform_indices = @transform_0, window_bounds = array<i64: 8, 128>}, {transform_indices = @transform_1, window_bounds = array<i64: 8, 128>}, {transform_indices = @transform_2, window_bounds = array<i64: 8, 128>}]} {
    %c0 = arith.constant 0 : index
    %c0_0 = arith.constant 0 : index
    %0 = vector.load %arg1[%c0, %c0_0] : memref<8x128xf32, #tpu.memory_space<vmem>>, vector<8x128xf32>
    %c0_1 = arith.constant 0 : index
    %c0_2 = arith.constant 0 : index
    %1 = vector.load %arg2[%c0_1, %c0_2] : memref<8x128xi32, #tpu.memory_space<vmem>>, vector<8x128xi32>
    %c429496730_i32 = arith.constant 429496730 : i32
    %2 = vector.broadcast %c429496730_i32 : i32 to vector<8x128xi32>
    %3 = arith.cmpi uge, %1, %2 : vector<8x128xi32>
    %cst = arith.constant 1.11111116 : f32
    %4 = vector.broadcast %cst : f32 to vector<8x128xf32>
    %5 = arith.mulf %0, %4 : vector<8x128xf32>
    %cst_3 = arith.constant 0.000000e+00 : f32
    %6 = vector.broadcast %cst_3 : f32 to vector<8x128xf32>
    %7 = arith.select %3, %5, %6 : vector<8x128xi1>, vector<8x128xf32>
    %c0_4 = arith.constant 0 : index
    %c0_5 = arith.constant 0 : index
    %8 = vector.load %arg3[%c0_4, %c0_5] : memref<8x128xf32, #tpu.memory_space<vmem>>, vector<8x128xf32>
    tpu.vector_store %arg3[%c0_4, %c0_5], %7 {strides = array<i32>} : memref<8x128xf32, #tpu.memory_space<vmem>>, vector<8x128xf32>,
    return
  }
  func.func @transform_0(%arg0: i32) -> (i32, i32) {
    %c0_i32 = arith.constant 0 : i32
    %c0_i32_0 = arith.constant 0 : i32
    return %arg0, %c0_i32 : i32, i32
  }
  func.func @transform_1(%arg0: i32) -> (i32, i32) {
    %c0_i32 = arith.constant 0 : i32
    %c0_i32_0 = arith.constant 0 : i32
    return %arg0, %c0_i32 : i32, i32
  }
  func.func @transform_2(%arg0: i32) -> (i32, i32) {
    %c0_i32 = arith.constant 0 : i32
    %c0_i32_0 = arith.constant 0 : i32
    return %arg0, %c0_i32 : i32, i32
  }
}

</mosaic_0001>

<bundles_post_ra>
// kernel: tpu_custom_call.1
= control target key start
LH: loop header
LB: loop body
LE: loop exit
PB: predicated region body
PF: predicated region fallthrough
CT: control target
= control target key end

     0   :  { %7 = vsyncpa [#allocation3], 0  ;;  %s187_s0 = inlined_call_operand.hbm [shape: f32[8,128], index: 0, kind: input, shape index: {}]   ;;  %s188_s1 = inlined_call_operand.hbm [shape: u32[8,128], index: 1, kind: input, shape index: {}]   ;;  %s189_s2 = inlined_call_operand.hbm [shape: f32[8,128], index: 2, kind: output, shape index: {}]  }
   0x1   :  { %8 = vsyncpa [#allocation6], 0 }
   0x2   :  { %9 = vsyncpa [#allocation4], 0  ;;  %s133_s9 = smov [#allocation2]   ;;  %s134_s11 = smov [#allocation5]  }
   0x3   :  { %s16_s10 = sshll.u32 %s133_s9, 4  ;;  %s26_s12 = sshll.u32 %s134_s11, 4  ;;  %s17_s10 = int_to_ptr.vmem [resolvable:$true] %s16_s10  ;;  %s27_s12 = int_to_ptr.vmem [resolvable:$true] %s26_s12 }
   0x4   :  { %s61_s15 = scalar_lea.hbm %s187_s0, 128 }
   0x5   :  { %p62_p0 = scmp.ne.s32.totalorder %s187_s0, %s61_s15  ;;  %p65_p1 = scmp.lt.u32.totalorder %s61_s15, %s187_s0 }
   0x7   :  { %p67_p2 = pnand %p65_p1, %p62_p0 }
   0x9   :  { %70 = shalt.err (!%p67_p2)
}
   0xa   :  { %s71_s20 = scalar_lea.vmem %s17_s10, 128  ;;  %p76_p4 = scmp.lt.s32.totalorder %s17_s10, %s17_s10 }
   0xb   :  { %p72_p3 = scmp.ne.s32.totalorder %s17_s10, %s71_s20  ;;  %p77_p5 = scmp.lt.s32.totalorder %s71_s20, %s71_s20 }
   0xd   :  { %p78_p6 = por %p77_p5, %p76_p4 }
   0xf   :  { %p79_p7 = pnand %p78_p6, %p72_p3 }
  0x11   :  { %82 = shalt.err (!%p79_p7)
}
  0x12   :  { %19 = dma.hbm_to_vmem [thread:$0]  %s187_s0, 128, %s17_s10, [#allocation3]  }
  0x13   :  { %s83_s25 = scalar_lea.hbm %s188_s1, 128 }
  0x14   :  { %p84_p8 = scmp.ne.s32.totalorder %s188_s1, %s83_s25  ;;  %p87_p9 = scmp.lt.u32.totalorder %s83_s25, %s188_s1 }
  0x16   :  { %p89_p10 = pnand %p87_p9, %p84_p8 }
  0x18   :  { %92 = shalt.err (!%p89_p10)
}
  0x19   :  { %s93_s30 = scalar_lea.vmem %s27_s12, 128  ;;  %p98_p12 = scmp.lt.s32.totalorder %s27_s12, %s27_s12 }
  0x1a   :  { %p94_p11 = scmp.ne.s32.totalorder %s27_s12, %s93_s30  ;;  %p99_p13 = scmp.lt.s32.totalorder %s93_s30, %s93_s30 }
  0x1c   :  { %p100_p0 = por %p99_p13, %p98_p12 }
  0x1e   :  { %p101_p1 = pnand %p100_p0, %p94_p11 }
  0x20   :  { %104 = shalt.err (!%p101_p1)
}
  0x21   :  { %29 = dma.hbm_to_vmem [thread:$0]  %s188_s1, 128, %s27_s12, [#allocation6]  }
  0x22   :  { %127 = dma.done.wait [#allocation3], 128  }
  0x23   :  { %128 = vsyncadd [#allocation3], 4294967168 }
  0x24   :  { %129 = dma.done.wait [#allocation6], 128  }
  0x25   :  { %130 = vsyncadd [#allocation6], 4294967168  ;;  %s135_s4 = smov [#allocation7]   ;;  %v36_v0 = vld [vmem:[#allocation2] sm:$0xff]  ;;  %v37_v1 = vld [vmem:[#allocation5] sm:$0xff] }
  0x26   :  { %s48_s5 = sshll.u32 %s135_s4, 4  ;;  %vm38_vm0 = vcmp.ge.u32.totalorder %v37_v1, 429496730  ;;  %v39_v2 = vmul.f32 1.1111112, %v36_v0  ;;  %s49_s5 = int_to_ptr.vmem [resolvable:$true] %s48_s5 }
  0x27   :  { %s105_s6 = scalar_lea.vmem %s49_s5, 128  ;;  %p110_p3 = scmp.lt.s32.totalorder %s49_s5, %s49_s5 }
  0x28   :  { %v40_v3 = vsel %vm38_vm0, %v39_v2, 0.0  ;;  %p106_p2 = scmp.ne.s32.totalorder %s49_s5, %s105_s6  ;;  %p111_p4 = scmp.lt.s32.totalorder %s105_s6, %s105_s6 }
  0x29   :  { %41 = vst [vmem:[#allocation7] sm:$0xff] %v40_v3 }
  0x2a   :  { %p112_p5 = por %p111_p4, %p110_p3 }
  0x2c   :  { %p113_p6 = pnand %p112_p5, %p106_p2 }
  0x2e   :  { %116 = shalt.err (!%p113_p6)
}
  0x2f   :  { %s117_s8 = scalar_lea.hbm %s189_s2, 128 }
  0x30   :  { %p118_p7 = scmp.ne.s32.totalorder %s189_s2, %s117_s8  ;;  %p121_p8 = scmp.lt.u32.totalorder %s117_s8, %s189_s2 }
  0x32   :  { %p123_p9 = pnand %p121_p8, %p118_p7 }
  0x34   :  { %126 = shalt.err (!%p123_p9)
}
  0x35   :  { %51 = dma.vmem_to_hbm [thread:$0]  %s49_s5, 128, %s189_s2, [#allocation4]  }
  0x36   :  { %131 = dma.done.wait [#allocation4], 128  }
  0x37   :  { %132 = vsyncadd [#allocation4], 4294967168 }
  0x38   :  { %55 = vsyncpa [#allocation3], 1 }
  0x39   :  { %56 = vsyncpa [#allocation6], 1 }
  0x3a   :  { %57 = vsyncpa [#allocation4], 1 }

</bundles_post_ra>
